<compile_context>
chip_gen: v6e
topology: v6e:2x2x1
jax: 0.10.0
libtpu: 0.0.40
codegen_flags: <defaults>
</compile_context>

<pallas_src>
import functools

import jax
import jax.numpy as jnp
from jax.experimental import pallas as pl
from jax.experimental.pallas import tpu as pltpu

HIDDEN_DIMS = (256, 128, 64)
OUTPUT_DIM = 88
LANE = 128
SUBLANE = 8
TM_CAP = 2048  # sized for in_feat ~ O(100s); fits 32 MiB scoped VMEM with headroom


def _round_up(n, m):
    return ((n + m - 1) // m) * m


def _mlp_kernel(x_ref, w1_ref, b1_ref, w2_ref, b2_ref, w3_ref, b3_ref,
                wo_ref, bo_ref, o_ref):
    """Fused MLP forward for one (TM, in_feat) batch tile.

    Input tile arrives as f32 and is cast to bf16 on-chip; bf16 matmuls on the MXU
    with f32 accumulation; bias-add/ReLU in f32 on the VPU; activations re-cast to
    bf16 between layers to keep vreg pressure low.
    """
    h = x_ref[...].astype(jnp.bfloat16)  # f32 HBM stream -> bf16 on-chip

    a = jnp.dot(h, w1_ref[...], preferred_element_type=jnp.float32) + b1_ref[...]
    h = jnp.maximum(a, 0.0).astype(jnp.bfloat16)

    a = jnp.dot(h, w2_ref[...], preferred_element_type=jnp.float32) + b2_ref[...]
    h = jnp.maximum(a, 0.0).astype(jnp.bfloat16)

    a = jnp.dot(h, w3_ref[...], preferred_element_type=jnp.float32) + b3_ref[...]
    h = jnp.maximum(a, 0.0).astype(jnp.bfloat16)

    o_ref[...] = (jnp.dot(h, wo_ref[...], preferred_element_type=jnp.float32)
                  + bo_ref[...]).astype(o_ref.dtype)


def prepare_params(params):
    """One-time parameter prep (hoisted out of the per-call forward path).

    PyTorch-style (out, in) f32 weights -> (in, out_pad) bf16.  The FIRST layer
    keeps its true in-dim (so the input never needs padding); subsequent layers
    pad their in-dim to 128 lanes to match the previous layer's padded output
    (extra rows are zero, so padded activation columns contribute nothing).
    Biases -> (1, out_pad) f32 rows, zero-padded.
    """
    prepped = []
    for idx, (w, b) in enumerate(params):
        out_f, in_f = w.shape
        in_p = in_f if idx == 0 else _round_up(in_f, LANE)
        out_p = _round_up(out_f, LANE)
        wt = jnp.zeros((in_p, out_p), jnp.bfloat16)
        wt = wt.at[:in_f, :out_f].set(w.T.astype(jnp.bfloat16))
        br = jnp.zeros((1, out_p), jnp.float32)
        br = br.at[:, :out_f].set(b.astype(jnp.float32))
        prepped.append((wt, br))
    return tuple(prepped)


@functools.partial(jax.jit, static_argnames=("out_dim",))
def deep_mlp_forward(x, prepped, *, out_dim=OUTPUT_DIM):
    """x: (batch, sequence_len, num_pitches) f32. Returns (batch, out_dim) f32."""
    (w1, b1), (w2, b2), (w3, b3), (wo, bo) = prepped
    in_feat = w1.shape[0]
    out_pad = wo.shape[1]

    batch = x.shape[0]
    x2d = x.reshape(batch, -1)            # nn.Flatten(): metadata-only, stays f32
    assert x2d.shape[1] == in_feat, (
        f"flattened feature dim {x2d.shape[1]} != first-layer in_features {in_feat}")

    # Batch tile selection:
    #  * small/medium batch: one fat (possibly overhanging) tile -> grid=(1,)
    #  * large batch: >= 2 tiles so both v7x TensorCores get work (batch axis is
    #    "parallel"), capped at TM_CAP for the 32 MiB scoped-VMEM budget.
    if batch <= 1024:
        tm = _round_up(batch, SUBLANE)
    else:
        tm = min(_round_up(pl.cdiv(batch, 2), SUBLANE), TM_CAP)
    grid = (pl.cdiv(batch, tm),)  # last block may overhang: rows are independent
                                  # and overhang rows are discarded below.

    const = lambda i: (0, 0)      # weights/biases: resident across the grid
    tiled = lambda i: (i, 0)      # activations: tiled along batch

    out = pl.pallas_call(
        _mlp_kernel,
        out_shape=jax.ShapeDtypeStruct((batch, out_pad), jnp.float32),
        grid=grid,
        in_specs=[
            pl.BlockSpec((tm, in_feat), tiled),
            pl.BlockSpec(w1.shape, const), pl.BlockSpec(b1.shape, const),
            pl.BlockSpec(w2.shape, const), pl.BlockSpec(b2.shape, const),
            pl.BlockSpec(w3.shape, const), pl.BlockSpec(b3.shape, const),
            pl.BlockSpec(wo.shape, const), pl.BlockSpec(bo.shape, const),
        ],
        out_specs=pl.BlockSpec((tm, out_pad), tiled),
        compiler_params=pltpu.CompilerParams(
            dimension_semantics=("parallel",),
            vmem_limit_bytes=32 * 1024 * 1024),
    )(x2d, w1, b1, w2, b2, w3, b3, wo, bo)

    # Slice (inside the same jit, fuses) back to the true output width.
    return out[:, :out_dim]


def init_params(key, sequence_len, num_pitches,
                hidden_dims=HIDDEN_DIMS, output_dim=OUTPUT_DIM):
    """Deterministic PyTorch-Linear-style init (uniform +/- 1/sqrt(fan_in))."""
    dims = [sequence_len * num_pitches] + list(hidden_dims) + [output_dim]
    params = []
    for i in range(len(dims) - 1):
        fan_in, fan_out = dims[i], dims[i + 1]
        key, kw, kb = jax.random.split(key, 3)
        bound = 1.0 / jnp.sqrt(jnp.float32(fan_in))
        w = jax.random.uniform(kw, (fan_out, fan_in), jnp.float32, -bound, bound)
        b = jax.random.uniform(kb, (fan_out,), jnp.float32, -bound, bound)
        params.append((w, b))
    return tuple(params)


def _reference_forward(x, params):
    """Plain-JAX f32 reference matching the PyTorch forward exactly."""
    h = x.reshape(x.shape[0], -1)
    for (w, b) in params[:-1]:
        h = jnp.maximum(h @ w.T + b, 0.0)
    wo, bo = params[-1]
    return h @ wo.T + bo


if __name__ == "__main__":
    batch, sequence_len, num_pitches = 2, 8, 16   # input_dim = 128
    key = jax.random.PRNGKey(0)
    key, kx = jax.random.split(key)

    x = jax.random.normal(kx, (batch, sequence_len, num_pitches), jnp.float32)
    params = init_params(key, sequence_len, num_pitches)
    prepped = prepare_params(params)   # one-time transpose / pad / bf16 cast

    out = deep_mlp_forward(x, prepped)
    out = jax.block_until_ready(out)

    ref = _reference_forward(x, params)
    assert out.shape == (batch, OUTPUT_DIM), out.shape
    # bf16 operands (f32 accumulation) -> looser tolerance vs the f32 reference.
    assert jnp.allclose(out, ref, atol=5e-2, rtol=5e-2), "mismatch vs reference"

    print("KERNEL_OK")
</pallas_src>

<mosaic_0001>
module attributes {stable_mosaic.version = 11 : i64} {
  func.func @_mlp_kernel(%arg0: i32, %arg1: memref<8x128xf32, #tpu.memory_space<vmem>>, %arg2: memref<128x256xbf16, #tpu.memory_space<vmem>>, %arg3: memref<1x256xf32, #tpu.memory_space<vmem>>, %arg4: memref<256x128xbf16, #tpu.memory_space<vmem>>, %arg5: memref<1x128xf32, #tpu.memory_space<vmem>>, %arg6: memref<128x128xbf16, #tpu.memory_space<vmem>>, %arg7: memref<1x128xf32, #tpu.memory_space<vmem>>, %arg8: memref<128x128xbf16, #tpu.memory_space<vmem>>, %arg9: memref<1x128xf32, #tpu.memory_space<vmem>>, %arg10: memref<8x128xf32, #tpu.memory_space<vmem>>) attributes {dimension_semantics = [#tpu.dimension_semantics<parallel>], iteration_bounds = array<i64: 1>, scalar_prefetch = 0 : i64, scratch_operands = 0 : i64, tpu.core_type = #tpu.core_type<tc>, window_params = [{transform_indices = @transform_0, window_bounds = array<i64: 8, 128>}, {pipeline_mode = #tpu.pipeline_mode<synchronous>, transform_indices = @transform_1, window_bounds = array<i64: 128, 256>}, {pipeline_mode = #tpu.pipeline_mode<synchronous>, transform_indices = @transform_2, window_bounds = array<i64: 1, 256>}, {pipeline_mode = #tpu.pipeline_mode<synchronous>, transform_indices = @transform_3, window_bounds = array<i64: 256, 128>}, {pipeline_mode = #tpu.pipeline_mode<synchronous>, transform_indices = @transform_4, window_bounds = array<i64: 1, 128>}, {pipeline_mode = #tpu.pipeline_mode<synchronous>, transform_indices = @transform_5, window_bounds = array<i64: 128, 128>}, {pipeline_mode = #tpu.pipeline_mode<synchronous>, transform_indices = @transform_6, window_bounds = array<i64: 1, 128>}, {pipeline_mode = #tpu.pipeline_mode<synchronous>, transform_indices = @transform_7, window_bounds = array<i64: 128, 128>}, {pipeline_mode = #tpu.pipeline_mode<synchronous>, transform_indices = @transform_8, window_bounds = array<i64: 1, 128>}, {transform_indices = @transform_9, window_bounds = array<i64: 8, 128>}]} {
    %c0 = arith.constant 0 : index
    %c0_0 = arith.constant 0 : index
    %0 = vector.load %arg1[%c0, %c0_0] : memref<8x128xf32, #tpu.memory_space<vmem>>, vector<8x128xf32>
    %1 = arith.truncf %0 : vector<8x128xf32> to vector<8x128xbf16>
    %c0_1 = arith.constant 0 : index
    %c0_2 = arith.constant 0 : index
    %2 = vector.load %arg2[%c0_1, %c0_2] : memref<128x256xbf16, #tpu.memory_space<vmem>>, vector<128x256xbf16>
    %cst = arith.constant dense<0.000000e+00> : vector<8x256xf32>
    %3 = tpu.matmul %1, %2, %cst {dimension_numbers = #tpu.dot_dimension_numbers<[1], [0], [0], [1], [0, 0, 1, 1], [], []>} : vector<8x128xbf16>, vector<128x256xbf16>, vector<8x256xf32> -> vector<8x256xf32>
    %c0_3 = arith.constant 0 : index
    %c0_4 = arith.constant 0 : index
    %4 = vector.load %arg3[%c0_3, %c0_4] : memref<1x256xf32, #tpu.memory_space<vmem>>, vector<1x256xf32>
    %5 = vector.broadcast %4 : vector<1x256xf32> to vector<8x256xf32>
    %6 = arith.addf %3, %5 : vector<8x256xf32>
    %cst_5 = arith.constant 0.000000e+00 : f32
    %7 = vector.broadcast %cst_5 : f32 to vector<8x256xf32>
    %8 = arith.maximumf %6, %7 : vector<8x256xf32>
    %9 = arith.truncf %8 : vector<8x256xf32> to vector<8x256xbf16>
    %c0_6 = arith.constant 0 : index
    %c0_7 = arith.constant 0 : index
    %10 = vector.load %arg4[%c0_6, %c0_7] : memref<256x128xbf16, #tpu.memory_space<vmem>>, vector<256x128xbf16>
    %cst_8 = arith.constant dense<0.000000e+00> : vector<8x128xf32>
    %11 = tpu.matmul %9, %10, %cst_8 {dimension_numbers = #tpu.dot_dimension_numbers<[1], [0], [0], [1], [0, 0, 1, 1], [], []>} : vector<8x256xbf16>, vector<256x128xbf16>, vector<8x128xf32> -> vector<8x128xf32>
    %c0_9 = arith.constant 0 : index
    %c0_10 = arith.constant 0 : index
    %12 = vector.load %arg5[%c0_9, %c0_10] : memref<1x128xf32, #tpu.memory_space<vmem>>, vector<1x128xf32>
    %13 = vector.broadcast %12 : vector<1x128xf32> to vector<8x128xf32>
    %14 = arith.addf %11, %13 : vector<8x128xf32>
    %cst_11 = arith.constant 0.000000e+00 : f32
    %15 = vector.broadcast %cst_11 : f32 to vector<8x128xf32>
    %16 = arith.maximumf %14, %15 : vector<8x128xf32>
    %17 = arith.truncf %16 : vector<8x128xf32> to vector<8x128xbf16>
    %c0_12 = arith.constant 0 : index
    %c0_13 = arith.constant 0 : index
    %18 = vector.load %arg6[%c0_12, %c0_13] : memref<128x128xbf16, #tpu.memory_space<vmem>>, vector<128x128xbf16>
    %cst_14 = arith.constant dense<0.000000e+00> : vector<8x128xf32>
    %19 = tpu.matmul %17, %18, %cst_14 {dimension_numbers = #tpu.dot_dimension_numbers<[1], [0], [0], [1], [0, 0, 1, 1], [], []>} : vector<8x128xbf16>, vector<128x128xbf16>, vector<8x128xf32> -> vector<8x128xf32>
    %c0_15 = arith.constant 0 : index
    %c0_16 = arith.constant 0 : index
    %20 = vector.load %arg7[%c0_15, %c0_16] : memref<1x128xf32, #tpu.memory_space<vmem>>, vector<1x128xf32>
    %21 = vector.broadcast %20 : vector<1x128xf32> to vector<8x128xf32>
    %22 = arith.addf %19, %21 : vector<8x128xf32>
    %cst_17 = arith.constant 0.000000e+00 : f32
    %23 = vector.broadcast %cst_17 : f32 to vector<8x128xf32>
    %24 = arith.maximumf %22, %23 : vector<8x128xf32>
    %25 = arith.truncf %24 : vector<8x128xf32> to vector<8x128xbf16>
    %c0_18 = arith.constant 0 : index
    %c0_19 = arith.constant 0 : index
    %26 = vector.load %arg8[%c0_18, %c0_19] : memref<128x128xbf16, #tpu.memory_space<vmem>>, vector<128x128xbf16>
    %cst_20 = arith.constant dense<0.000000e+00> : vector<8x128xf32>
    %27 = tpu.matmul %25, %26, %cst_20 {dimension_numbers = #tpu.dot_dimension_numbers<[1], [0], [0], [1], [0, 0, 1, 1], [], []>} : vector<8x128xbf16>, vector<128x128xbf16>, vector<8x128xf32> -> vector<8x128xf32>
    %c0_21 = arith.constant 0 : index
    %c0_22 = arith.constant 0 : index
    %28 = vector.load %arg9[%c0_21, %c0_22] : memref<1x128xf32, #tpu.memory_space<vmem>>, vector<1x128xf32>
    %29 = vector.broadcast %28 : vector<1x128xf32> to vector<8x128xf32>
    %30 = arith.addf %27, %29 : vector<8x128xf32>
    %c0_23 = arith.constant 0 : index
    %c0_24 = arith.constant 0 : index
    %31 = vector.load %arg10[%c0_23, %c0_24] : memref<8x128xf32, #tpu.memory_space<vmem>>, vector<8x128xf32>
    tpu.vector_store %arg10[%c0_23, %c0_24], %30 {strides = array<i32>} : memref<8x128xf32, #tpu.memory_space<vmem>>, vector<8x128xf32>,
    return
  }
  func.func @transform_0(%arg0: i32) -> (i32, i32) {
    %c0_i32 = arith.constant 0 : i32
    %c0_i32_0 = arith.constant 0 : i32
    return %arg0, %c0_i32 : i32, i32
  }
  func.func @transform_1(%arg0: i32) -> (i32, i32) {
    %c0_i32 = arith.constant 0 : i32
    %c0_i32_0 = arith.constant 0 : i32
    %c0_i32_1 = arith.constant 0 : i32
    return %c0_i32, %c0_i32_0 : i32, i32
  }
  func.func @transform_2(%arg0: i32) -> (i32, i32) {
    %c0_i32 = arith.constant 0 : i32
    %c0_i32_0 = arith.constant 0 : i32
    %c0_i32_1 = arith.constant 0 : i32
    return %c0_i32, %c0_i32_0 : i32, i32
  }
  func.func @transform_3(%arg0: i32) -> (i32, i32) {
    %c0_i32 = arith.constant 0 : i32
    %c0_i32_0 = arith.constant 0 : i32
    %c0_i32_1 = arith.constant 0 : i32
    return %c0_i32, %c0_i32_0 : i32, i32
  }
  func.func @transform_4(%arg0: i32) -> (i32, i32) {
    %c0_i32 = arith.constant 0 : i32
    %c0_i32_0 = arith.constant 0 : i32
    %c0_i32_1 = arith.constant 0 : i32
    return %c0_i32, %c0_i32_0 : i32, i32
  }
  func.func @transform_5(%arg0: i32) -> (i32, i32) {
    %c0_i32 = arith.constant 0 : i32
    %c0_i32_0 = arith.constant 0 : i32
    %c0_i32_1 = arith.constant 0 : i32
    return %c0_i32, %c0_i32_0 : i32, i32
  }
  func.func @transform_6(%arg0: i32) -> (i32, i32) {
    %c0_i32 = arith.constant 0 : i32
    %c0_i32_0 = arith.constant 0 : i32
    %c0_i32_1 = arith.constant 0 : i32
    return %c0_i32, %c0_i32_0 : i32, i32
  }
  func.func @transform_7(%arg0: i32) -> (i32, i32) {
    %c0_i32 = arith.constant 0 : i32
    %c0_i32_0 = arith.constant 0 : i32
    %c0_i32_1 = arith.constant 0 : i32
    return %c0_i32, %c0_i32_0 : i32, i32
  }
  func.func @transform_8(%arg0: i32) -> (i32, i32) {
    %c0_i32 = arith.constant 0 : i32
    %c0_i32_0 = arith.constant 0 : i32
    %c0_i32_1 = arith.constant 0 : i32
    return %c0_i32, %c0_i32_0 : i32, i32
  }
  func.func @transform_9(%arg0: i32) -> (i32, i32) {
    %c0_i32 = arith.constant 0 : i32
    %c0_i32_0 = arith.constant 0 : i32
    return %arg0, %c0_i32 : i32, i32
  }
}

</mosaic_0001>

<bundles_post_ra>
// kernel: deep_mlp_forward.1
= control target key start
LH: loop header
LB: loop body
LE: loop exit
PB: predicated region body
PF: predicated region fallthrough
CT: control target
= control target key end

     0   :  { %14 = vsyncpa [#allocation3], 0  ;;  %s1095_s0 = inlined_call_operand.vmem [shape: f32[2,128], index: 0, kind: input, shape index: {}]   ;;  %s1096_s1 = inlined_call_operand.hbm [shape: bf16[128,256], index: 1, kind: input, shape index: {}]   ;;  %s1097_s2 = inlined_call_operand.vmem [shape: f32[1,256], index: 2, kind: input, shape index: {}]   ;;  %s1098_s3 = inlined_call_operand.hbm [shape: bf16[256,128], index: 3, kind: input, shape index: {}]   ;;  %s1099_s4 = inlined_call_operand.vmem [shape: f32[1,128], index: 4, kind: input, shape index: {}]   ;;  %s1100_s5 = inlined_call_operand.hbm [shape: bf16[128,128], index: 5, kind: input, shape index: {}]   ;;  %s1101_s6 = inlined_call_operand.vmem [shape: f32[1,128], index: 6, kind: input, shape index: {}]   ;;  %s1102_s7 = inlined_call_operand.hbm [shape: bf16[128,128], index: 7, kind: input, shape index: {}]   ;;  %s1103_s8 = inlined_call_operand.vmem [shape: f32[1,128], index: 8, kind: input, shape index: {}]   ;;  %s1104_s9 = inlined_call_operand.hbm [shape: f32[2,128], index: 9, kind: output, shape index: {}]  }
   0x1   :  { %15 = vsyncpa [#allocation6], 0 }
   0x2   :  { %16 = vsyncpa [#allocation9], 0 }
   0x3   :  { %17 = vsyncpa [#allocation4], 0  ;;  %s974_s30 = smov [#allocation5]  }
   0x4   :  { %s39_s10 = sshll.u32 %s974_s30, 4  ;;  %s40_s10 = int_to_ptr.vmem [resolvable:$true] %s39_s10 }
   0x5   :  { %s874_s11 = scalar_lea.vmem %s40_s10, 2048  ;;  %p879_p1 = scmp.lt.s32.totalorder %s40_s10, %s40_s10 }
   0x6   :  { %p875_p0 = scmp.ne.s32.totalorder %s40_s10, %s874_s11  ;;  %p880_p2 = scmp.lt.s32.totalorder %s874_s11, %s874_s11 }
   0x8   :  { %p881_p3 = por %p880_p2, %p879_p1 }
   0xa   :  { %p882_p4 = pnand %p881_p3, %p875_p0 }
   0xc   :  { %885 = shalt.err (!%p882_p4)
}
   0xd   :  { %s975_s12 = smov 64   ;;  %s976_s13 = smov 4  }
   0xe   :  { %45 = dma.hbm_to_vmem [thread:$0]  %s1098_s3, 2048, %s40_s10, [#allocation6], %s975_s12, %s975_s12, %s976_s13  }
   0xf   :  { %s977_s16 = smov [#allocation2]  }
  0x10   :  { %s25_s17 = sshll.u32 %s977_s16, 4  ;;  %s26_s17 = int_to_ptr.vmem [resolvable:$true] %s25_s17 }
  0x11   :  { %s894_s18 = scalar_lea.vmem %s26_s17, 2048  ;;  %p899_p6 = scmp.lt.s32.totalorder %s26_s17, %s26_s17 }
  0x12   :  { %p895_p5 = scmp.ne.s32.totalorder %s26_s17, %s894_s18  ;;  %p900_p7 = scmp.lt.s32.totalorder %s894_s18, %s894_s18 }
  0x14   :  { %p901_p8 = por %p900_p7, %p899_p6 }
  0x16   :  { %p902_p9 = pnand %p901_p8, %p895_p5 }
  0x18   :  { %905 = shalt.err (!%p902_p9)
}
  0x19   :  { %s978_s19 = smov 128   ;;  %s979_s20 = smov 8  }
  0x1a   :  { %31 = dma.hbm_to_vmem [thread:$0]  %s1096_s1, 2048, %s26_s17, [#allocation3], %s978_s19, %s978_s19, %s979_s20  }
  0x1b   :  { %s980_s23 = smov [#allocation7]   ;;  %s981_s25 = smov [#allocation8]  }
  0x1c   :  { %s53_s24 = sshll.u32 %s980_s23, 4  ;;  %s67_s3 = sshll.u32 %s981_s25, 4  ;;  %s54_s24 = int_to_ptr.vmem [resolvable:$true] %s53_s24  ;;  %s68_s3 = int_to_ptr.vmem [resolvable:$true] %s67_s3 }
  0x1d   :  { %s914_s26 = scalar_lea.vmem %s54_s24, 1024  ;;  %p919_p11 = scmp.lt.s32.totalorder %s54_s24, %s54_s24 }
  0x1e   :  { %p915_p10 = scmp.ne.s32.totalorder %s54_s24, %s914_s26  ;;  %p920_p12 = scmp.lt.s32.totalorder %s914_s26, %s914_s26 }
  0x20   :  { %p921_p13 = por %p920_p12, %p919_p11 }
  0x22   :  { %p922_p0 = pnand %p921_p13, %p915_p10 }
  0x24   :  { %925 = shalt.err (!%p922_p0)
}
  0x25   :  { %59 = dma.hbm_to_vmem [thread:$0]  %s1100_s5, 1024, %s54_s24, [#allocation6], %s975_s12, %s975_s12, %s976_s13  }
  0x26   :  { %s934_s1 = scalar_lea.vmem %s68_s3, 1024  ;;  %p939_p2 = scmp.lt.s32.totalorder %s68_s3, %s68_s3 }
  0x27   :  { %p935_p1 = scmp.ne.s32.totalorder %s68_s3, %s934_s1  ;;  %p940_p3 = scmp.lt.s32.totalorder %s934_s1, %s934_s1 }
  0x29   :  { %p941_p4 = por %p940_p3, %p939_p2 }
  0x2b   :  { %p942_p5 = pnand %p941_p4, %p935_p1 }
  0x2d   :  { %945 = shalt.err (!%p942_p5)
}
  0x2e   :  { %73 = dma.hbm_to_vmem [thread:$0]  %s1102_s7, 1024, %s68_s3, [#allocation9], %s975_s12, %s975_s12, %s976_s13  }
  0x2f   :  { %966 = dma.done.wait [#allocation3], 2048  }
  0x30   :  { %967 = vsyncadd [#allocation3], 4294965248 }
  0x31   :  { %968 = dma.done.wait [#allocation6], 3072  }
  0x32   :  { %969 = vsyncadd [#allocation6], 4294964224 }
  0x33   :  { %970 = dma.done.wait [#allocation9], 1024  }
  0x34   :  { %971 = vsyncadd [#allocation9], 4294966272  ;;  %v982_v0 = vmov 0   ;;  %v810_v1 = vld [vmem:[#allocation2 + $0x74] ss:$8 sps:$4 sm:$0xff]   ;;  %v838_v15 = vld [vmem:[#allocation5 + $0x68] sm:$0xff]   ;;  %v109_v41 = vlaneseq }
  0x35   :  { %231 = vmatprep.mubr.bf16.mxu0 %v982_v0  ;;  %v812_v2 = vld [vmem:[#allocation2 + $0x70] ss:$8 sps:$4 sm:$0xff]   ;;  %199 = vmatprep.subr.bf16.mxu0 %v810_v1  ;;  %v813_v3 = vld [vmem:[#allocation2 + $0x64] ss:$8 sps:$4 sm:$0xff]   ;;  %v815_v4 = vld [vmem:[#allocation2 + $0x60] ss:$8 sps:$4 sm:$0xff]  }
  0x36   :  { %200 = vmatpush1.bf16.msra.mxu0 %v812_v2  ;;  %v816_v5 = vld [vmem:[#allocation2 + $0x54] ss:$8 sps:$4 sm:$0xff]   ;;  %v818_v6 = vld [vmem:[#allocation2 + $0x50] ss:$8 sps:$4 sm:$0xff]   ;;  %v819_v7 = vld [vmem:[#allocation2 + $0x44] ss:$8 sps:$4 sm:$0xff]  }
  0x37   :  { %201 = vmatprep.subr.bf16.mxu0 %v813_v3  ;;  %v821_v8 = vld [vmem:[#allocation2 + $0x40] ss:$8 sps:$4 sm:$0xff]   ;;  %v822_v9 = vld [vmem:[#allocation2 + $0x34] ss:$8 sps:$4 sm:$0xff]   ;;  %v824_v12 = vld [vmem:[#allocation2 + $0x30] ss:$8 sps:$4 sm:$0xff]  }
  0x38   :  { %v834_v10 = vld [vmem:[#allocation5 + $0x78] sm:$0xff]   ;;  %v836_v13 = vld [vmem:[#allocation5 + $0x70] sm:$0xff]   ;;  %v825_v16 = vld [vmem:[#allocation2 + $0x24] ss:$8 sps:$4 sm:$0xff]   ;;  %v983_v36 = vmov 0.0   ;;  %v110_v42 = vshrl.u32 %v109_v41, 7 }
  0x39   :  { %v835_v11 = vld [vmem:[#allocation5 + $0x38] sm:$0xff]   ;;  %716 = vmatprep.subr.bf16.mxu1 %v834_v10  ;;  %v837_v14 = vld [vmem:[#allocation5 + $0x30] sm:$0xff]   ;;  %v827_v17 = vld [vmem:[#allocation2 + $0x20] ss:$8 sps:$4 sm:$0xff]   ;;  %vm984_vm0 = vmmov 0  }
  0x3a   :  { %202 = vmatpush1.bf16.msra.mxu0 %v815_v4  ;;  %717 = vmatpush3.bf16.msra.mxu1 %v835_v11  ;;  %v839_v18 = vld [vmem:[#allocation5 + $0x28] sm:$0xff]   ;;  %v840_v19 = vld [vmem:[#allocation5 + $0x60] sm:$0xff]   ;;  %v828_v20 = vld [vmem:[#allocation2 + $0x14] ss:$8 sps:$4 sm:$0xff]   ;;  %v111_v43 = vsub.s32 0, %v110_v42  ;;  %v115_v45 = vsub.s32 1, %v110_v42 }
  0x3b   :  { %203 = vmatprep.subr.bf16.mxu0 %v816_v5  ;;  %718 = vmatprep.subr.bf16.mxu1 %v836_v13  ;;  %v830_v21 = vld [vmem:[#allocation2 + $0x10] ss:$8 sps:$4 sm:$0xff]   ;;  %v831_v22 = vld [vmem:[#allocation2 + $0x4] ss:$8 sps:$4 sm:$0xff]   ;;  %v833_v26 = vld [vmem:[#allocation2] ss:$8 sps:$4 sm:$0xff]  }
  0x3c   :  { %v841_v23 = vld [vmem:[#allocation5 + $0x20] sm:$0xff]   ;;  %v842_v24 = vld [vmem:[#allocation5 + $0x58] sm:$0xff]   ;;  %v844_v28 = vld [vmem:[#allocation5 + $0x50] sm:$0xff]  }
  0x3d   :  { %v843_v25 = vld [vmem:[#allocation5 + $0x18] sm:$0xff]   ;;  %v89_v27 = vld [vmem:[%s1095_s0] sm:$0xff]  ;;  %v845_v29 = vld [vmem:[#allocation5 + $0x10] sm:$0xff]  }
  0x3e   :  { %204 = vmatpush1.bf16.msra.mxu0 %v818_v6  ;;  %719 = vmatpush3.bf16.msra.mxu1 %v837_v14  ;;  %v90_v30 = vpack.c.bf16 %v89_v27, %v89_v27  ;;  %v846_v31 = vld [vmem:[#allocation5 + $0x48] sm:$0xff]   ;;  %v848_v33 = vld [vmem:[#allocation5 + $0x40] sm:$0xff]   ;;  %v850_v35 = vld [vmem:[#allocation7 + $0x38] sm:$0xff]  }
  0x3f   :  { %205 = vmatprep.subr.bf16.mxu0 %v819_v7  ;;  %720 = vmatprep.subr.bf16.mxu1 %v838_v15  ;;  %v847_v32 = vld [vmem:[#allocation5 + $0x8] sm:$0xff]   ;;  %v849_v34 = vld [vmem:[#allocation5] sm:$0xff]   ;;  %v851_v37 = vld [vmem:[#allocation7 + $0x30] sm:$0xff]  }
  0x40   :  { %v852_v38 = vld [vmem:[#allocation7 + $0x28] sm:$0xff]   ;;  %v853_v39 = vld [vmem:[#allocation7 + $0x20] sm:$0xff]   ;;  %v854_v40 = vld [vmem:[#allocation7 + $0x18] sm:$0xff]  }
  0x41   :  { %v107_v44 = vld [vmem:[%s1097_s2] sm:$0x3]  ;;  %v855_v58 = vld [vmem:[#allocation7 + $0x10] sm:$0xff]   ;;  %v856_v59 = vld [vmem:[#allocation7 + $0x8] sm:$0xff]  }
  0x42   :  { %206 = vmatpush1.bf16.msra.mxu0 %v821_v8  ;;  %721 = vmatpush3.bf16.msra.mxu1 %v839_v18  ;;  %v112_v46 = vrot.slane %v107_v44, %v111_v43  ;;  %v116_v47 = vrot.slane %v107_v44, %v115_v45  ;;  %v857_v60 = vld [vmem:[#allocation7] sm:$0xff]   ;;  %v858_v61 = vld [vmem:[#allocation8 + $0x38] sm:$0xff]   ;;  %v859_v62 = vld [vmem:[#allocation8 + $0x30] sm:$0xff]  }
  0x43   :  { %207 = vmatprep.subr.bf16.mxu0 %v822_v9  ;;  %722 = vmatprep.subr.bf16.mxu1 %v840_v19  ;;  %v860_v63 = vld [vmem:[#allocation8 + $0x28] sm:$0xff]   ;;  %v861_v0 = vld [vmem:[#allocation8 + $0x20] sm:$0xff]   ;;  %v862_v1 = vld [vmem:[#allocation8 + $0x18] sm:$0xff]  }
  0x44   :  { %v863_v2 = vld [vmem:[#allocation8 + $0x10] sm:$0xff]   ;;  %v681_v4 = vld [vmem:[%s1099_s4] ss:$0 sm:$0xff] }
  0x45   :  { %v865_v13 = vld [vmem:[#allocation8] sm:$0xff]  }
  0x46   :  { %208 = vmatpush1.bf16.msra.mxu0 %v824_v12  ;;  %723 = vmatpush3.bf16.msra.mxu1 %v841_v23  ;;  %v864_v12 = vld [vmem:[#allocation8 + $0x8] sm:$0xff]   ;;  %v698_v14 = vld [vmem:[%s1101_s6] ss:$0 sm:$0xff] }
  0x47   :  { %209 = vmatprep.subr.bf16.mxu0 %v825_v16  ;;  %724 = vmatprep.subr.bf16.mxu1 %v842_v24 }
  0x4a   :  { %210 = vmatpush1.bf16.msra.mxu0 %v827_v17  ;;  %725 = vmatpush3.bf16.msra.mxu1 %v843_v25 }
  0x4b   :  { %211 = vmatprep.subr.bf16.mxu0 %v828_v20  ;;  %726 = vmatprep.subr.bf16.mxu1 %v844_v28 }
  0x4e   :  { %212 = vmatpush1.bf16.msra.mxu0 %v830_v21  ;;  %727 = vmatpush3.bf16.msra.mxu1 %v845_v29 }
  0x4f   :  { %213 = vmatprep.subr.bf16.mxu0 %v831_v22  ;;  %728 = vmatprep.subr.bf16.mxu1 %v846_v31  ;;  %v707_v22 = vld [vmem:[%s1103_s8] ss:$0 sm:$0xff] }
  0x52   :  { %214 = vmatpush1.bf16.msra.mxu0 %v833_v26  ;;  %729 = vmatpush3.bf16.msra.mxu1 %v847_v32 }
  0x53   :  { %730 = vmatprep.subr.bf16.mxu1 %v848_v33  ;;  %756 = vmatprep.subr.bf16.mxu0 %v983_v36 }
  0x55   :  { %232 = vmatmul.mubr.bf16.vlgmr.msra.gmra.mxu0 %v90_v30 }
  0x56   :  { %731 = vmatpush3.bf16.msra.mxu1 %v849_v34  ;;  %757 = vmatpush3.bf16.msra.mxu0 %v850_v35 }
  0x57   :  { %776 = vmatprep.subr.bf16.mxu1 %v983_v36  ;;  %758 = vmatprep.subr.bf16.mxu0 %v983_v36 }
  0x58   :  { %772 = vmatprep.mubr.msk.bf16.mxu0 %vm984_vm0, %v983_v36 }
  0x5a   :  { %759 = vmatpush3.bf16.msra.mxu0 %v851_v37 }
  0x5b   :  { %760 = vmatprep.subr.bf16.mxu0 %v983_v36 }
  0x5e   :  { %761 = vmatpush3.bf16.msra.mxu0 %v852_v38 }
  0x5f   :  { %762 = vmatprep.subr.bf16.mxu0 %v983_v36 }
  0x62   :  { %763 = vmatpush3.bf16.msra.mxu0 %v853_v39 }
  0x63   :  { %764 = vmatprep.subr.bf16.mxu0 %v983_v36 }
  0x66   :  { %765 = vmatpush3.bf16.msra.mxu0 %v854_v40 }
  0x67   :  { %766 = vmatprep.subr.bf16.mxu0 %v983_v36 }
  0x6a   :  { %767 = vmatpush3.bf16.msra.mxu0 %v855_v58 }
  0x6b   :  { %768 = vmatprep.subr.bf16.mxu0 %v983_v36 }
  0x6e   :  { %769 = vmatpush3.bf16.msra.mxu0 %v856_v59 }
  0x6f   :  { %770 = vmatprep.subr.bf16.mxu0 %v983_v36 }
  0x72   :  { %771 = vmatpush3.bf16.msra.mxu0 %v857_v60 }
 0x115   :  { %v233_v48 = vpop.f32.mrf.mxu0 }
 0x116   :  { %v234_v49 = vadd.f32 %v233_v48, %v112_v46 }
 0x117   :  { %v235_v50 = vpop.f32.mrf.mxu0 }
 0x118   :  { %v236_v51 = vadd.f32 %v235_v50, %v116_v47  ;;  %v240_v52 = vmax.f32 %v234_v49, 0.0 }
 0x119   :  { %v237_v53 = vpop.f32.mrf.mxu0 }
 0x11a   :  { %v241_v54 = vmax.f32 %v236_v51, 0.0  ;;  %v242_v57 = vpack.c.bf16 %v240_v52, %v240_v52 }
 0x11b   :  { %v238_v55 = vpop.f32.mrf.mxu0 }
 0x11c   :  { %v243_v56 = vpack.c.bf16 %v241_v54, %v241_v54 }
 0x11e   :  { %411 = vmatprep.mubr.bf16.mxu1 %v243_v56 }
 0x11f   :  { %412 = vmatmul.mubr.bf16.vlgmr.msra.gmra.mxu1 %v242_v57 }
 0x120   :  { %792 = vmatprep.mubr.msk.bf16.mxu1 %vm984_vm0, %v983_v36  ;;  %777 = vmatpush3.bf16.msra.mxu1 %v858_v61 }
 0x121   :  { %778 = vmatprep.subr.bf16.mxu1 %v983_v36 }
 0x124   :  { %779 = vmatpush3.bf16.msra.mxu1 %v859_v62 }
 0x125   :  { %780 = vmatprep.subr.bf16.mxu1 %v983_v36 }
 0x128   :  { %781 = vmatpush3.bf16.msra.mxu1 %v860_v63 }
 0x129   :  { %782 = vmatprep.subr.bf16.mxu1 %v983_v36 }
 0x12c   :  { %783 = vmatpush3.bf16.msra.mxu1 %v861_v0 }
 0x12d   :  { %784 = vmatprep.subr.bf16.mxu1 %v983_v36 }
 0x130   :  { %785 = vmatpush3.bf16.msra.mxu1 %v862_v1 }
 0x131   :  { %786 = vmatprep.subr.bf16.mxu1 %v983_v36 }
 0x134   :  { %787 = vmatpush3.bf16.msra.mxu1 %v863_v2 }
 0x135   :  { %788 = vmatprep.subr.bf16.mxu1 %v983_v36 }
 0x138   :  { %789 = vmatpush3.bf16.msra.mxu1 %v864_v12 }
 0x139   :  { %790 = vmatprep.subr.bf16.mxu1 %v983_v36 }
 0x13c   :  { %791 = vmatpush3.bf16.msra.mxu1 %v865_v13 }
 0x1df   :  { %v732_v3 = vpop.f32.mrf.mxu1 }
 0x1e1   :  { %v733_v5 = vpop.f32.mrf.mxu1 }
 0x1e2   :  { %v734_v6 = vadd.f32 %v733_v5, %v732_v3 }
 0x1e3   :  { %v735_v7 = vpop.f32.mrf.mxu1 }
 0x1e4   :  { %v414_v8 = vadd.f32 %v734_v6, %v681_v4 }
 0x1e5   :  { %v736_v9 = vpop.f32.mrf.mxu1 }
 0x1e6   :  { %v419_v10 = vmax.f32 %v414_v8, 0.0 }
 0x1e8   :  { %v420_v11 = vpack.c.bf16 %v419_v10, %v419_v10 }
 0x1ea   :  { %773 = vmatmul.mubr.bf16.vlgmr.msra.gmra.mxu0 %v420_v11 }
 0x2aa   :  { %v526_v15 = vpop.f32.mrf.mxu0 }
 0x2ab   :  { %v527_v16 = vadd.f32 %v698_v14, %v526_v15 }
 0x2ac   :  { %v774_v17 = vpop.f32.mrf.mxu0 }
 0x2ad   :  { %v532_v18 = vmax.f32 %v527_v16, 0.0 }
 0x2ae   :  { %v529_v19 = vpop.f32.mrf.mxu0 }
 0x2af   :  { %v533_v20 = vpack.c.bf16 %v532_v18, %v532_v18 }
 0x2b0   :  { %v775_v21 = vpop.f32.mrf.mxu0 }
 0x2b1   :  { %793 = vmatmul.mubr.bf16.vlgmr.msra.gmra.mxu1 %v533_v20 }
 0x371   :  { %v639_v23 = vpop.f32.mrf.mxu1 }
 0x372   :  { %v640_v24 = vadd.f32 %v707_v22, %v639_v23 }
 0x373   :  { %v794_v25 = vpop.f32.mrf.mxu1 }
 0x374   :  { %645 = vst [vmem:[#allocation10] sm:$0xff] %v640_v24 }
 0x375   :  { %v642_v26 = vpop.f32.mrf.mxu1 }
 0x377   :  { %v795_v27 = vpop.f32.mrf.mxu1 }
 0x378   :  { %650 = vsyncadd [#allocation4], 96  ;;  %s985_s6 = smov [#allocation10]  }
 0x379   :  { %s651_s15 = sshll.u32 %s985_s6, 4  ;;  %s652_s15 = int_to_ptr.vmem [resolvable:$true] %s651_s15 }
 0x37a   :  { %s946_s16 = scalar_lea.vmem %s652_s15, 32  ;;  %s950_s17 = scalar_lea.vmem %s652_s15, 128 }
 0x37b   :  { %p947_p6 = scmp.ne.s32.totalorder %s652_s15, %s946_s16  ;;  %p951_p7 = scmp.lt.s32.totalorder %s652_s15, %s652_s15 }
 0x37c   :  { %p952_p8 = scmp.lt.s32.totalorder %s950_s17, %s946_s16 }
 0x37e   :  { %p953_p9 = por %p952_p8, %p951_p7 }
 0x380   :  { %p954_p10 = pnand %p953_p9, %p947_p6 }
 0x382   :  { %957 = shalt.err (!%p954_p10)
}
 0x383   :  { %s986_s18 = smov 32   ;;  %s987_s8 = smov 2  }
 0x384   :  { %657 = dma.vmem_to_hbm [thread:$0]  %s652_s15, 32, %s1104_s9, [#allocation4], %s986_s18, %s986_s18, %s987_s8  }
 0x385   :  { %972 = dma.done.wait [#allocation4], 128  }
 0x386   :  { %973 = vsyncadd [#allocation4], 4294967168 }
 0x387   :  { %661 = vsyncpa [#allocation3], 1 }
 0x388   :  { %662 = vsyncpa [#allocation6], 1 }
 0x389   :  { %663 = vsyncpa [#allocation9], 1 }
 0x38a   :  { %664 = vsyncpa [#allocation4], 1 }

</bundles_post_ra>
